<compile_context>
chip_gen: v7x
topology: tpu7x:2x2x1
jax: 0.10.0
libtpu: 0.0.40
codegen_flags: <defaults>
</compile_context>

<pallas_src>
import jax
import jax.numpy as jnp
from jax.experimental import pallas as pl
from jax.experimental.pallas import tpu as pltpu

_LANES = 128
_DEFAULT_TILE_SUBLANES = 2048   # v7x: 2048-4096, v6e: 1024-2048, v5e: >=512
_MIN_GRID_STEPS = 4             # keep both v7x TCs busy + overlap writeback


def _round_up(x, m):
    return ((x + m - 1) // m) * m


def _choose_spatial_tile(chunks, n_batch, target):
    """Pick the sublane-chunk tile: (8,128)-legal, large enough to amortize
    per-step overhead, preferring an exact divisor of `chunks` (no partial
    edge block), and split so that N * tiles >= _MIN_GRID_STEPS when possible.
    """
    target = max(8, _round_up(target, 8))
    if chunks <= target:
        tsb = chunks                       # block == full dim -> always legal
    else:
        tsb = None
        for t in range(target, 7, -8):     # exact divisor -> no partial block
            if chunks % t == 0:
                tsb = t
                break
        if tsb is None:
            tsb = target                   # partial edge block (elementwise-safe)
    # Best-effort split so at least _MIN_GRID_STEPS grid steps exist.
    while n_batch * pl.cdiv(chunks, tsb) < _MIN_GRID_STEPS and tsb > 8:
        new_tsb = max(8, _round_up(tsb // 2, 8))
        if new_tsb == tsb:
            break
        tsb = new_tsb
    return tsb


def _make_outconv_kernel(cin, cout):
    """VPU broadcast-FMA kernel for a 1x1 conv with static tiny cin/cout."""

    def kernel(x_ref, w_ref, b_ref, o_ref):
        # x_ref: (cin, TSB, 128) VMEM block (batch dim squeezed out)
        # w_ref: (cout, cin) f32 in SMEM
        # b_ref: (cout,)     f32 in SMEM
        # o_ref: (cout, TSB, 128) VMEM block
        # Hoisted loads: each input channel tile is read from VMEM exactly once.
        xs = [x_ref[ci].astype(jnp.float32) for ci in range(cin)]
        for co in range(cout):              # tiny static loops (cin=4, cout=3)
            acc = xs[0] * w_ref[co, 0] + b_ref[co]
            for ci in range(1, cin):
                acc = acc + xs[ci] * w_ref[co, ci]
            o_ref[co] = acc.astype(o_ref.dtype)

    return kernel


def outconv_forward(x_nchw, weight, bias, *,
                    spatial_tile_sublanes=_DEFAULT_TILE_SUBLANES):
    """1x1 conv forward (OutConv).

    x_nchw : (N, Cin, H, W)
    weight : (Cout, Cin) or (Cout, Cin, 1, 1)  (PyTorch layout)
    bias   : (Cout,)
    returns: (N, Cout, H, W)
    """
    N, Cin, H, W = x_nchw.shape
    if weight.ndim == 4:  # (Cout, Cin, 1, 1) -> (Cout, Cin)
        weight = weight.reshape(weight.shape[0], weight.shape[1])
    Cout = weight.shape[0]
    assert weight.shape[1] == Cin, "weight/input channel mismatch"
    # The fully unrolled broadcast-FMA path is only sane for tiny channel
    # counts (OutConv). Larger channels should use an MXU matmul kernel.
    assert Cin <= 16 and Cout <= 16, "use an MXU matmul kernel for Cin/Cout > 16"

    # Lane-dense spatial view: (N, Cin, chunks, 128).
    S = H * W
    chunks = pl.cdiv(S, _LANES)
    S_lane = chunks * _LANES

    x3 = x_nchw.reshape(N, Cin, S)
    if S_lane != S:
        # TODO(synk): only hit when H*W % 128 != 0; costs one extra copy.
        x3 = jnp.pad(x3, ((0, 0), (0, 0), (0, S_lane - S)))
    x4 = x3.reshape(N, Cin, chunks, _LANES)   # contiguous view, no transpose

    tsb = _choose_spatial_tile(chunks, N, spatial_tile_sublanes)
    n_tiles = pl.cdiv(chunks, tsb)            # partial edge block OK (elementwise)

    w_smem = weight.astype(jnp.float32)       # (Cout, Cin) scalars in SMEM
    b_smem = bias.astype(jnp.float32)         # (Cout,)     scalars in SMEM

    # Right-size the scoped VMEM limit from the actual double-buffered footprint.
    dtype_bytes = jnp.dtype(x_nchw.dtype).itemsize
    block_bytes = (Cin + Cout) * tsb * _LANES * dtype_bytes
    vmem_limit = int(2 * block_bytes * 1.25) + (2 << 20)   # 2 bufs + 25% + slack
    vmem_limit = min(max(vmem_limit, 8 << 20), 64 << 20)

    out4 = pl.pallas_call(
        _make_outconv_kernel(Cin, Cout),
        out_shape=jax.ShapeDtypeStruct((N, Cout, chunks, _LANES), x_nchw.dtype),
        grid=(N, n_tiles),
        in_specs=[
            pl.BlockSpec((None, Cin, tsb, _LANES), lambda n, s: (n, 0, s, 0)),
            pl.BlockSpec(memory_space=pltpu.MemorySpace.SMEM),   # weight
            pl.BlockSpec(memory_space=pltpu.MemorySpace.SMEM),   # bias
        ],
        out_specs=pl.BlockSpec((None, Cout, tsb, _LANES), lambda n, s: (n, 0, s, 0)),
        compiler_params=pltpu.CompilerParams(
            dimension_semantics=("parallel", "parallel"),
            vmem_limit_bytes=vmem_limit,
        ),
    )(x4, w_smem, b_smem)

    out = out4.reshape(N, Cout, S_lane)
    if S_lane != S:
        out = out[:, :, :S]
    return out.reshape(N, Cout, H, W)


if __name__ == "__main__":
    key = jax.random.PRNGKey(0)
    k_x, k_w, k_b = jax.random.split(key, 3)

    N, Cin, H, W = 2, 4, 16, 16
    Cout = 3

    x = jax.random.normal(k_x, (N, Cin, H, W), dtype=jnp.float32)
    # Synthetic Conv2d(Cin, Cout, 1) params: weight (Cout, Cin), bias (Cout,)
    bound = 1.0 / (Cin ** 0.5)
    weight = jax.random.uniform(k_w, (Cout, Cin), minval=-bound, maxval=bound,
                                dtype=jnp.float32)
    bias = jax.random.uniform(k_b, (Cout,), minval=-bound, maxval=bound,
                              dtype=jnp.float32)

    out = outconv_forward(x, weight, bias)
    out = jax.block_until_ready(out)

    # Reference: pure-JAX 1x1 conv over the channel dim.
    ref = jnp.einsum("nchw,oc->nohw", x, weight) + bias[None, :, None, None]
    assert out.shape == (N, Cout, H, W)
    assert jnp.allclose(out, ref, atol=1e-5, rtol=1e-5)

    print("KERNEL_OK")
</pallas_src>

<mosaic_0001>
module attributes {stable_mosaic.version = 11 : i64} {
  func.func @kernel(%arg0: i32, %arg1: i32, %arg2: memref<1x4x2x128xf32, #tpu.memory_space<vmem>>, %arg3: memref<3x4xf32, #tpu.memory_space<smem>>, %arg4: memref<3xf32, #tpu.memory_space<smem>>, %arg5: memref<1x3x2x128xf32, #tpu.memory_space<vmem>>) attributes {dimension_semantics = [#tpu.dimension_semantics<parallel>, #tpu.dimension_semantics<parallel>], iteration_bounds = array<i64: 2, 1>, scalar_prefetch = 0 : i64, scratch_operands = 0 : i64, tpu.core_type = #tpu.core_type<tc>, window_params = [{transform_indices = @transform_0, window_bounds = array<i64: 1, 4, 2, 128>}, {transform_indices = @transform_1, window_bounds = array<i64: 3, 4>}, {transform_indices = @transform_2, window_bounds = array<i64: 3>}, {transform_indices = @transform_3, window_bounds = array<i64: 1, 3, 2, 128>}]} {
    %c0 = arith.constant 0 : index
    %c0_0 = arith.constant 0 : index
    %c0_1 = arith.constant 0 : index
    %c0_2 = arith.constant 0 : index
    %0 = vector.load %arg2[%c0, %c0_0, %c0_1, %c0_2] : memref<1x4x2x128xf32, #tpu.memory_space<vmem>>, vector<1x1x2x128xf32>
    %1 = vector.shape_cast %0 : vector<1x1x2x128xf32> to vector<2x128xf32>
    %c0_3 = arith.constant 0 : index
    %c1 = arith.constant 1 : index
    %c0_4 = arith.constant 0 : index
    %c0_5 = arith.constant 0 : index
    %2 = vector.load %arg2[%c0_3, %c1, %c0_4, %c0_5] : memref<1x4x2x128xf32, #tpu.memory_space<vmem>>, vector<1x1x2x128xf32>
    %3 = vector.shape_cast %2 : vector<1x1x2x128xf32> to vector<2x128xf32>
    %c0_6 = arith.constant 0 : index
    %c2 = arith.constant 2 : index
    %c0_7 = arith.constant 0 : index
    %c0_8 = arith.constant 0 : index
    %4 = vector.load %arg2[%c0_6, %c2, %c0_7, %c0_8] : memref<1x4x2x128xf32, #tpu.memory_space<vmem>>, vector<1x1x2x128xf32>
    %5 = vector.shape_cast %4 : vector<1x1x2x128xf32> to vector<2x128xf32>
    %c0_9 = arith.constant 0 : index
    %c3 = arith.constant 3 : index
    %c0_10 = arith.constant 0 : index
    %c0_11 = arith.constant 0 : index
    %6 = vector.load %arg2[%c0_9, %c3, %c0_10, %c0_11] : memref<1x4x2x128xf32, #tpu.memory_space<vmem>>, vector<1x1x2x128xf32>
    %7 = vector.shape_cast %6 : vector<1x1x2x128xf32> to vector<2x128xf32>
    %c0_12 = arith.constant 0 : index
    %c0_13 = arith.constant 0 : index
    %8 = memref.load %arg3[%c0_12, %c0_13] : memref<3x4xf32, #tpu.memory_space<smem>>
    %9 = vector.broadcast %8 : f32 to vector<2x128xf32>
    %10 = arith.mulf %1, %9 : vector<2x128xf32>
    %c0_14 = arith.constant 0 : index
    %11 = memref.load %arg4[%c0_14] : memref<3xf32, #tpu.memory_space<smem>>
    %12 = vector.broadcast %11 : f32 to vector<2x128xf32>
    %13 = arith.addf %10, %12 : vector<2x128xf32>
    %c0_15 = arith.constant 0 : index
    %c1_16 = arith.constant 1 : index
    %14 = memref.load %arg3[%c0_15, %c1_16] : memref<3x4xf32, #tpu.memory_space<smem>>
    %15 = vector.broadcast %14 : f32 to vector<2x128xf32>
    %16 = arith.mulf %3, %15 : vector<2x128xf32>
    %17 = arith.addf %13, %16 : vector<2x128xf32>
    %c0_17 = arith.constant 0 : index
    %c2_18 = arith.constant 2 : index
    %18 = memref.load %arg3[%c0_17, %c2_18] : memref<3x4xf32, #tpu.memory_space<smem>>
    %19 = vector.broadcast %18 : f32 to vector<2x128xf32>
    %20 = arith.mulf %5, %19 : vector<2x128xf32>
    %21 = arith.addf %17, %20 : vector<2x128xf32>
    %c0_19 = arith.constant 0 : index
    %c3_20 = arith.constant 3 : index
    %22 = memref.load %arg3[%c0_19, %c3_20] : memref<3x4xf32, #tpu.memory_space<smem>>
    %23 = vector.broadcast %22 : f32 to vector<2x128xf32>
    %24 = arith.mulf %7, %23 : vector<2x128xf32>
    %25 = arith.addf %21, %24 : vector<2x128xf32>
    %c0_21 = arith.constant 0 : index
    %c0_22 = arith.constant 0 : index
    %c0_23 = arith.constant 0 : index
    %c0_24 = arith.constant 0 : index
    %26 = vector.load %arg5[%c0_21, %c0_22, %c0_23, %c0_24] : memref<1x3x2x128xf32, #tpu.memory_space<vmem>>, vector<1x1x2x128xf32>
    %27 = vector.shape_cast %26 : vector<1x1x2x128xf32> to vector<2x128xf32>
    %28 = vector.shape_cast %25 : vector<2x128xf32> to vector<1x1x2x128xf32>
    tpu.vector_store %arg5[%c0_21, %c0_22, %c0_23, %c0_24], %28 {strides = array<i32>} : memref<1x3x2x128xf32, #tpu.memory_space<vmem>>, vector<1x1x2x128xf32>,
    %c1_25 = arith.constant 1 : index
    %c0_26 = arith.constant 0 : index
    %29 = memref.load %arg3[%c1_25, %c0_26] : memref<3x4xf32, #tpu.memory_space<smem>>
    %30 = vector.broadcast %29 : f32 to vector<2x128xf32>
    %31 = arith.mulf %1, %30 : vector<2x128xf32>
    %c1_27 = arith.constant 1 : index
    %32 = memref.load %arg4[%c1_27] : memref<3xf32, #tpu.memory_space<smem>>
    %33 = vector.broadcast %32 : f32 to vector<2x128xf32>
    %34 = arith.addf %31, %33 : vector<2x128xf32>
    %c1_28 = arith.constant 1 : index
    %c1_29 = arith.constant 1 : index
    %35 = memref.load %arg3[%c1_28, %c1_29] : memref<3x4xf32, #tpu.memory_space<smem>>
    %36 = vector.broadcast %35 : f32 to vector<2x128xf32>
    %37 = arith.mulf %3, %36 : vector<2x128xf32>
    %38 = arith.addf %34, %37 : vector<2x128xf32>
    %c1_30 = arith.constant 1 : index
    %c2_31 = arith.constant 2 : index
    %39 = memref.load %arg3[%c1_30, %c2_31] : memref<3x4xf32, #tpu.memory_space<smem>>
    %40 = vector.broadcast %39 : f32 to vector<2x128xf32>
    %41 = arith.mulf %5, %40 : vector<2x128xf32>
    %42 = arith.addf %38, %41 : vector<2x128xf32>
    %c1_32 = arith.constant 1 : index
    %c3_33 = arith.constant 3 : index
    %43 = memref.load %arg3[%c1_32, %c3_33] : memref<3x4xf32, #tpu.memory_space<smem>>
    %44 = vector.broadcast %43 : f32 to vector<2x128xf32>
    %45 = arith.mulf %7, %44 : vector<2x128xf32>
    %46 = arith.addf %42, %45 : vector<2x128xf32>
    %c0_34 = arith.constant 0 : index
    %c1_35 = arith.constant 1 : index
    %c0_36 = arith.constant 0 : index
    %c0_37 = arith.constant 0 : index
    %47 = vector.load %arg5[%c0_34, %c1_35, %c0_36, %c0_37] : memref<1x3x2x128xf32, #tpu.memory_space<vmem>>, vector<1x1x2x128xf32>
    %48 = vector.shape_cast %47 : vector<1x1x2x128xf32> to vector<2x128xf32>
    %49 = vector.shape_cast %46 : vector<2x128xf32> to vector<1x1x2x128xf32>
    tpu.vector_store %arg5[%c0_34, %c1_35, %c0_36, %c0_37], %49 {strides = array<i32>} : memref<1x3x2x128xf32, #tpu.memory_space<vmem>>, vector<1x1x2x128xf32>,
    %c2_38 = arith.constant 2 : index
    %c0_39 = arith.constant 0 : index
    %50 = memref.load %arg3[%c2_38, %c0_39] : memref<3x4xf32, #tpu.memory_space<smem>>
    %51 = vector.broadcast %50 : f32 to vector<2x128xf32>
    %52 = arith.mulf %1, %51 : vector<2x128xf32>
    %c2_40 = arith.constant 2 : index
    %53 = memref.load %arg4[%c2_40] : memref<3xf32, #tpu.memory_space<smem>>
    %54 = vector.broadcast %53 : f32 to vector<2x128xf32>
    %55 = arith.addf %52, %54 : vector<2x128xf32>
    %c2_41 = arith.constant 2 : index
    %c1_42 = arith.constant 1 : index
    %56 = memref.load %arg3[%c2_41, %c1_42] : memref<3x4xf32, #tpu.memory_space<smem>>
    %57 = vector.broadcast %56 : f32 to vector<2x128xf32>
    %58 = arith.mulf %3, %57 : vector<2x128xf32>
    %59 = arith.addf %55, %58 : vector<2x128xf32>
    %c2_43 = arith.constant 2 : index
    %c2_44 = arith.constant 2 : index
    %60 = memref.load %arg3[%c2_43, %c2_44] : memref<3x4xf32, #tpu.memory_space<smem>>
    %61 = vector.broadcast %60 : f32 to vector<2x128xf32>
    %62 = arith.mulf %5, %61 : vector<2x128xf32>
    %63 = arith.addf %59, %62 : vector<2x128xf32>
    %c2_45 = arith.constant 2 : index
    %c3_46 = arith.constant 3 : index
    %64 = memref.load %arg3[%c2_45, %c3_46] : memref<3x4xf32, #tpu.memory_space<smem>>
    %65 = vector.broadcast %64 : f32 to vector<2x128xf32>
    %66 = arith.mulf %7, %65 : vector<2x128xf32>
    %67 = arith.addf %63, %66 : vector<2x128xf32>
    %c0_47 = arith.constant 0 : index
    %c2_48 = arith.constant 2 : index
    %c0_49 = arith.constant 0 : index
    %c0_50 = arith.constant 0 : index
    %68 = vector.load %arg5[%c0_47, %c2_48, %c0_49, %c0_50] : memref<1x3x2x128xf32, #tpu.memory_space<vmem>>, vector<1x1x2x128xf32>
    %69 = vector.shape_cast %68 : vector<1x1x2x128xf32> to vector<2x128xf32>
    %70 = vector.shape_cast %67 : vector<2x128xf32> to vector<1x1x2x128xf32>
    tpu.vector_store %arg5[%c0_47, %c2_48, %c0_49, %c0_50], %70 {strides = array<i32>} : memref<1x3x2x128xf32, #tpu.memory_space<vmem>>, vector<1x1x2x128xf32>,
    return
  }
  func.func @transform_0(%arg0: i32, %arg1: i32) -> (i32, i32, i32, i32) {
    %c0_i32 = arith.constant 0 : i32
    %c0_i32_0 = arith.constant 0 : i32
    %c0_i32_1 = arith.constant 0 : i32
    return %arg0, %c0_i32, %arg1, %c0_i32_0 : i32, i32, i32, i32
  }
  func.func @transform_1(%arg0: i32, %arg1: i32) -> (i32, i32) {
    %c0_i32 = arith.constant 0 : i32
    %c0_i32_0 = arith.constant 0 : i32
    %c0_i32_1 = arith.constant 0 : i32
    return %c0_i32, %c0_i32_0 : i32, i32
  }
  func.func @transform_2(%arg0: i32, %arg1: i32) -> i32 {
    %c0_i32 = arith.constant 0 : i32
    %c0_i32_0 = arith.constant 0 : i32
    return %c0_i32 : i32
  }
  func.func @transform_3(%arg0: i32, %arg1: i32) -> (i32, i32, i32, i32) {
    %c0_i32 = arith.constant 0 : i32
    %c0_i32_0 = arith.constant 0 : i32
    %c0_i32_1 = arith.constant 0 : i32
    return %arg0, %c0_i32, %arg1, %c0_i32_0 : i32, i32, i32, i32
  }
}

</mosaic_0001>

<bundles_post_ra>
// kernel: tpu_custom_call.1
= control target key start
LH: loop header
LB: loop body
LE: loop exit
PB: predicated region body
PF: predicated region fallthrough
CT: control target
= control target key end

     0   :  { %8 = vsyncpa [#allocation3], 0  ;;  %s961_s0 = inlined_call_operand.hbm [shape: f32[2,4,2,128], index: 0, kind: input, shape index: {}]   ;;  %s962_s1 = inlined_call_operand.hbm [shape: f32[3,4], index: 1, kind: input, shape index: {}]   ;;  %s963_s2 = inlined_call_operand.vmem [shape: f32[3], index: 2, kind: input, shape index: {}]   ;;  %s964_s3 = inlined_call_operand.hbm [shape: f32[2,3,2,128], index: 3, kind: output, shape index: {}]  }
   0x1   :  { %10 = vsyncpa [#allocation3 + $0x1], 0 }
   0x2   :  { %11 = vsyncpa [#allocation5], 0 }
   0x3   :  { %12 = vsyncpa [#allocation6], 0 }
   0x4   :  { %13 = vsyncpa [#allocation4], 0 }
   0x5   :  { %15 = vsyncpa [#allocation4 + $0x1], 0  ;;  %s723_s12 = smov 0   ;;  %s725_s13 = smov 0  }
   0x6   :  { %s727_s14 = smov 0   ;;  %s729_s15 = smov 0  }
   0x7   :  { %s731_s16 = smov 0   ;;  %s733_s17 = smov 0  }
   0x8 LB: > { %s421_s18 = sadd.s32 4294967295, %s693_s17   ;;  %s422_s19 = sadd.s32 4294967294, %s693_s17   ;;  %s693_s17 = sphi %s733_s17, %s21_s17   ;;  %s689_s16 = sphi %s731_s16, %s985_s16   ;;  %s685_s15 = sphi %s729_s15, %s984_s15   ;;  %s681_s14 = sphi %s727_s14, %s983_s14   ;;  %s677_s13 = sphi %s725_s13, %s982_s13   ;;  %s673_s12 = sphi %s723_s12, %s981_s12  }
   0x9   : > { %s42_s20 = sadd.s32 1, %s681_s14  ;;  %p49_p0 = scmp.ne.s32.totalorder %s681_s14, %s677_s13 }
   0xa   : > { %p50_p1 = scmp.eq.s32.totalorder %s693_s17, 0  ;;  %p55_p2 = scmp.ne.s32.totalorder %s677_s13, %s673_s12 }
   0xb   : > { %p761_p3 = scmp.eq.s32.totalorder %s421_s18, 0  ;;  %p123_p4 = scmp.eq.s32.totalorder %s421_s18, 1 }
   0xc   : > { %p51_p5 = por %p50_p1, %p49_p0  ;;  %p129_p6 = scmp.eq.s32.totalorder %s422_s19, 1 }
   0xd   : > { %s969_s21 = scalar_select %p761_p3, 1, 0 }
   0xe   : > { %p767_p7 = por %p761_p3, %p55_p2  ;;  %p771_p8 = por %p123_p4, %p49_p0 }
   0xf   : > { %p775_p9 = por %p129_p6, %p55_p2  ;;  %p423_p10 = scmp.ge.s32.totalorder %s693_s17, 1 }
  0x10   : > { %s970_s22 = scalar_select %p767_p7, 1, 0 }
  0x11   : > { %s971_s23 = scalar_select %p771_p8, 1, 0 }
  0x12   : > { %s972_s24 = scalar_select %p775_p9, 1, 0 }
  0x13   : > { %p136_p11 = scmp.lt.s32.totalorder %s693_s17, 3  ;;  %p487_p1 = scmp.lt.s32.totalorder %s693_s17, 2 }
  0x14   : > { %s158_s28 = sshll.u32 %s963_s2, 4  ;;  %s169_s4 = sand.u32 1, %s681_s14   ;;  %s159_s28 = int_to_ptr.vmem [resolvable:$true] %s158_s28 }
  0x15   : > { %p782_p13 = pnand %p423_p10, %p136_p11  ;;  %p792_p4 = pnand %p487_p1, %p51_p5 }
  0x16   : > { %s33_s5 = sadd.s32 1, %s689_s16  ;;  %s545_s8 = scalar_lea.hbm %s962_s1, 64 }
  0x17   : > { %p470_p0 = pneg %p782_p13  ;;  %p546_p5 = scmp.ne.s32.totalorder %s962_s1, %s545_s8 }
  0x18   : > { %p552_p1 = scmp.lt.u32.totalorder %s545_s8, %s962_s1 }
  0x19   : > { %p798_p2 = pnand %p470_p0, %p761_p3 }
  0x1b   : > { %p547_p6 = pneg %p798_p2 }
  0x1d   : > { %p548_p10 = pnand %p547_p6, %p546_p5 }
  0x1f   : > { %p549_p11 = pneg %p548_p10 }
  0x21   : > { %p554_p0 = pnand %p552_p1, %p549_p11 }
  0x23   : > { %557 = shalt.err (!%p554_p0)
}
  0x24   : > { %s695_s19 = smov [#allocation7]   ;;  %s558_s6 = scalar_lea.vmem %s159_s28, 16 }
  0x25   : > { %473 = dma.hbm_to_smem (!%p798_p2), %s962_s1, 64, %s695_s19, [#allocation5]  }
  0x26   : > { %p559_p12 = scmp.ne.s32.totalorder %s159_s28, %s558_s6  ;;  %p566_p3 = scmp.lt.s32.totalorder %s159_s28, %s159_s28 }
  0x27   : > { %p567_p5 = scmp.lt.s32.totalorder %s558_s6, %s558_s6 }
  0x28   : > { %p561_p9 = pnand %p559_p12, %p547_p6 }
  0x29   : > { %p568_p10 = por %p567_p5, %p566_p3 }
  0x2a   : > { %p562_p8 = pneg %p561_p9 }
  0x2c   : > { %p569_p7 = pnand %p568_p10, %p562_p8 }
  0x2e   : > { %572 = shalt.err (!%p569_p7)
}
  0x2f   : > { %s696_s7 = smov [#allocation8]   ;;  %p35_p11 = scmp.ge.s32.totalorder %s33_s5, 2 }
  0x30   : > { %476 = dma.vmem_to_smem (!%p798_p2), %s159_s28, 16, %s696_s7, [#allocation6]  }
  0x31   : > { %s427_s8 = sshll.u32 %s169_s4, 3  ;;  %s455_s9 = sshll.u32 %s689_s16, 7 }
  0x32   : > { %s987_s5 = smov (%p35_p11, %s33_s5), 0  ;;  %s830_s30 = scalar_lea.hbm %s961_s0, %s455_s9 }
  0x33   : > { %s37_s18 = ssub.s32 %s689_s16, %s987_s5  ;;  %s173_s19 = scalar_lea.vmem [#allocation2], %s427_s8 }
  0x34   : > { %s181_s28 = sshll.u32 %s173_s19, 4  ;;  %p40_p3 = scmp.eq.s32.totalorder %s37_s18, 0  ;;  %s834_s28 = int_to_ptr.vmem [resolvable:$true] %s181_s28 }
  0x35   : > { %s843_s27 = scalar_lea.sflag [#allocation3], %s169_s4  ;;  %s573_s6 = scalar_lea.hbm %s830_s30, 128 }
  0x36   : > { %s839_s26 = scalar_select %p40_p3, %s681_s14, %s42_s20  }
  0x37   : > { %p574_p7 = scmp.ne.s32.totalorder %s830_s30, %s573_s6  ;;  %p575_p8 = pneg %p792_p4 }
  0x38   : > { %s578_s9 = scalar_lea.hbm %s961_s0, 256  ;;  %p579_p2 = scmp.lt.u32.totalorder %s830_s30, %s961_s0 }
  0x39   : > { %p576_p9 = pnand %p575_p8, %p574_p7  ;;  %p580_p6 = scmp.lt.u32.totalorder %s578_s9, %s573_s6 }
  0x3a   : > { %p582_p0 = scmp.lt.u32.totalorder %s573_s6, %s830_s30 }
  0x3b   : > { %p577_p12 = pneg %p576_p9  ;;  %p581_p1 = por %p580_p6, %p579_p2 }
  0x3d   : > { %p583_p5 = por %p582_p0, %p581_p1 }
  0x3f   : > { %p584_p10 = pnand %p583_p5, %p577_p12 }
  0x41   : > { %587 = shalt.err (!%p584_p10)
}
  0x42   : > { %s588_s20 = scalar_lea.vmem %s834_s28, 128  ;;  %s697_s4 = smov [#allocation2]  }
  0x43   : > { %p589_p11 = scmp.ne.s32.totalorder %s834_s28, %s588_s20  ;;  %s593_s18 = sshll.u32 %s697_s4, 4  ;;  %s594_s18 = int_to_ptr.vmem [resolvable:$false] %s593_s18 }
  0x44   : > { %s595_s19 = scalar_lea.vmem %s594_s18, 256  ;;  %p596_p9 = scmp.lt.s32.totalorder %s834_s28, %s594_s18 }
  0x45   : > { %p591_p3 = pnand %p589_p11, %p575_p8  ;;  %p597_p2 = scmp.lt.s32.totalorder %s595_s19, %s588_s20 }
  0x47   : > { %p592_p7 = pneg %p591_p3  ;;  %p598_p6 = por %p597_p2, %p596_p9 }
  0x49   : > { %p599_p1 = pnand %p598_p6, %p592_p7 }
  0x4b   : > { %602 = shalt.err (!%p599_p1)
}
  0x4c   : > { %s698_s6 = smov 32   ;;  %s699_s7 = smov 2  }
  0x4d   : > { %480 = dma.hbm_to_vmem [thread:$0]  (!%p792_p4), %s830_s30, 128, %s834_s28, %s843_s27, %s698_s6, %s698_s6, %s699_s7  }
  0x4e   : > { %193 = sbr.rel (%p782_p13) target bundleno = 131 (0x83), region = 32  ;;  %s874_s8 = sand.u32 (!%p782_p13), 1, %s677_s13  }
  0x4f   : > { %s431_s9 = sshll.u32 (!%p782_p13), %s874_s8, 3  ;;  %s196_s10 = scalar_lea.sflag (!%p782_p13), [#allocation3], %s874_s8 }
  0x50   : > { %s199_s11 = scalar_lea.vmem (!%p782_p13), [#allocation2], %s431_s9  ;;  %p976_p8 = scmp.ne.s32.totalorder (!%p782_p13), %s970_s22, 0 }
  0x55   : > { %656 = dma.done.wait (%p976_p8), %s196_s10, 128  }
  0x56   : > { %658 = vsyncadd (%p976_p8), %s196_s10, 4294967168  ;;  %p977_p12 = scmp.ne.s32.totalorder %s969_s21, 0 }
  0x58   : > { %660 = dma.done.wait (%p977_p12), [#allocation5], 64  }
  0x59   : > { %662 = vsyncadd (%p977_p12), [#allocation5], 4294967232 }
  0x5a   : > { %664 = dma.done.wait (%p977_p12), [#allocation6], 16  }
  0x5b   : > { %666 = vsyncadd (%p977_p12), [#allocation6], 4294967280 }
  0x5c   : > { %212 = sfence }
  0x5d   : > { %s238_s25 = sld [smem:[#allocation7]]  ;;  %s437_s30 = sld [smem:[#allocation7 + $0x1]]  ;;  %v231_v0 = vld [vmem:[%s199_s11] sm:$0x3]  ;;  %v434_v1 = vld [vmem:[%s199_s11 + $0x2] sm:$0x3] }
  0x5e   : > { %s241_s29 = sld [smem:[#allocation8]]  ;;  %s438_s28 = sld [smem:[#allocation7 + $0x2]]  ;;  %v435_v2 = vld [vmem:[%s199_s11 + $0x4] sm:$0x3]  ;;  %v436_v4 = vld [vmem:[%s199_s11 + $0x6] sm:$0x3] }
  0x5f   : > { %s439_s27 = sld [smem:[#allocation7 + $0x3]]  ;;  %s440_s22 = sld [smem:[#allocation7 + $0x80]] }
  0x60   : > { %s890_s20 = sld [smem:[#allocation8 + $0x1]]  ;;  %s443_s18 = sld [smem:[#allocation7 + $0x82]] }
  0x61   : > { %s442_s4 = sld [smem:[#allocation7 + $0x81]]  ;;  %s444_s19 = sld [smem:[#allocation7 + $0x83]] }
  0x62   : > { %s892_s21 = sld [smem:[#allocation7 + $0x100]]  ;;  %s894_s6 = sld [smem:[#allocation8 + $0x2]] }
  0x63   : > { %v239_v3 = vstv %s238_s25  ;;  %v245_v7 = vstv %s437_s30  ;;  %s448_s7 = sld [smem:[#allocation7 + $0x101]]  ;;  %s896_s9 = sld [smem:[#allocation7 + $0x102]] }
  0x64   : > { %v240_v5 = vmul.f32 %v239_v3, %v231_v0  ;;  %v242_v6 = vstv %s241_s29  ;;  %v249_v8 = vstv %s438_s28  ;;  %v246_v10 = vmul.f32 %v434_v1, %v245_v7  ;;  %s898_s10 = sld [smem:[#allocation7 + $0x103]]  ;;  %s456_s11 = smul.u32 6, %s874_s8 }
  0x65   : > { %v250_v11 = vmul.f32 %v435_v2, %v249_v8  ;;  %v253_v12 = vstv %s439_s27  ;;  %v258_v14 = vstv %s440_s22  ;;  %s457_s30 = smul.u32 96, %s685_s15  ;;  %p978_p4 = scmp.ne.s32.totalorder %s971_s23, 0 }
  0x66   : > { %v243_v9 = vadd.f32 %v242_v6, %v240_v5  ;;  %v254_v13 = vmul.f32 %v436_v4, %v253_v12  ;;  %v259_v16 = vmul.f32 %v258_v14, %v231_v0  ;;  %v261_v17 = vstv %s890_s20  ;;  %s230_s25 = scalar_lea.vmem [#allocation9], %s456_s11  ;;  %s298_s20 = scalar_lea.sflag [#allocation4], %s874_s8 }
  0x67   : > { %v264_v18 = vstv %s442_s4  ;;  %v268_v20 = vstv %s443_s18  ;;  %v272_v21 = vstv %s444_s19  ;;  %s312_s29 = sshll.u32 %s230_s25, 4  ;;  %s912_s22 = scalar_lea.hbm %s964_s3, %s457_s30  ;;  %s907_s29 = int_to_ptr.vmem [resolvable:$true] %s312_s29 }
  0x68   : > { %v247_v15 = vadd.f32 %v246_v10, %v243_v9  ;;  %v265_v19 = vmul.f32 %v434_v1, %v264_v18  ;;  %v262_v23 = vadd.f32 %v261_v17, %v259_v16  ;;  %v269_v24 = vmul.f32 %v435_v2, %v268_v20  ;;  %s603_s4 = scalar_lea.vmem %s907_s29, 96  ;;  %s700_s15 = smov [#allocation9]  }
  0x69   : > { %v273_v25 = vmul.f32 %v436_v4, %v272_v21  ;;  %v278_v26 = vstv %s892_s21  ;;  %v281_v27 = vstv %s894_s6  ;;  %v284_v28 = vstv %s448_s7  ;;  %p604_p13 = scmp.ne.s32.totalorder %s907_s29, %s603_s4  ;;  %s607_s18 = sshll.u32 %s700_s15, 4  ;;  %s608_s18 = int_to_ptr.vmem [resolvable:$false] %s607_s18 }
  0x6a   : > { %v251_v22 = vadd.f32 %v250_v11, %v247_v15  ;;  %v288_v29 = vstv %s896_s9  ;;  %v266_v31 = vadd.f32 %v265_v19, %v262_v23  ;;  %v279_v32 = vmul.f32 %v278_v26, %v231_v0  ;;  %s609_s19 = scalar_lea.vmem %s608_s18, 192  ;;  %p610_p10 = scmp.lt.s32.totalorder %s907_s29, %s608_s18 }
  0x6b   : > { %v285_v33 = vmul.f32 %v434_v1, %v284_v28  ;;  %v292_v34 = vstv %s898_s10  ;;  %v289_v37 = vmul.f32 %v435_v2, %v288_v29  ;;  %p605_p0 = pnand %p604_p13, %p978_p4  ;;  %p611_p11 = scmp.lt.s32.totalorder %s609_s19, %s603_s4 }
  0x6c   : > { %v255_v30 = vadd.f32 %v254_v13, %v251_v22  ;;  %v270_v35 = vadd.f32 %v269_v24, %v266_v31  ;;  %v282_v36 = vadd.f32 %v281_v27, %v279_v32  ;;  %v293_v40 = vmul.f32 %v436_v4, %v292_v34 }
  0x6d   : > { %p606_p5 = pneg %p605_p0  ;;  %p612_p3 = por %p611_p11, %p610_p10 }
  0x6e   : > { %256 = vst [vmem:[%s230_s25] sm:$0x3] %v255_v30  ;;  %v274_v38 = vadd.f32 %v273_v25, %v270_v35  ;;  %v286_v39 = vadd.f32 %v285_v33, %v282_v36 }
  0x6f   : > { %p613_p7 = pnand %p612_p3, %p606_p5 }
  0x70   : > { %445 = vst [vmem:[%s230_s25 + $0x2] sm:$0x3] %v274_v38  ;;  %v290_v41 = vadd.f32 %v289_v37, %v286_v39 }
  0x72   : > { %v294_v42 = vadd.f32 %v293_v40, %v290_v41 }
  0x74   : > { %451 = vst [vmem:[%s230_s25 + $0x4] sm:$0x3] %v294_v42 }
  0x75   : > { %616 = shalt.err (!%p613_p7)
}
  0x76   : > { %s617_s21 = scalar_lea.hbm %s912_s22, 96  ;;  %s621_s9 = scalar_lea.hbm %s964_s3, 192 }
  0x77   : > { %p618_p9 = scmp.ne.s32.totalorder %s912_s22, %s617_s21  ;;  %p622_p1 = scmp.lt.u32.totalorder %s912_s22, %s964_s3 }
  0x78   : > { %p623_p8 = scmp.lt.u32.totalorder %s621_s9, %s617_s21  ;;  %p625_p13 = scmp.lt.u32.totalorder %s617_s21, %s912_s22 }
  0x79   : > { %p619_p2 = pnand %p618_p9, %p978_p4 }
  0x7a   : > { %p624_p12 = por %p623_p8, %p622_p1 }
  0x7b   : > { %p620_p6 = pneg %p619_p2 }
  0x7c   : > { %p626_p0 = por %p625_p13, %p624_p12 }
  0x7e   : > { %p627_p5 = pnand %p626_p0, %p620_p6 }
  0x80   : > { %630 = shalt.err (!%p627_p5)
}
  0x81   : > { %s701_s25 = smov 32   ;;  %s702_s30 = smov 2  }
  0x82   : > { %468 = dma.vmem_to_hbm [thread:$0]  (%p978_p4), %s907_s29, 96, %s912_s22, %s298_s20, %s701_s25, %s701_s25, %s702_s30  }
  0x83 PF: > { %s327_s28 = sand.u32 1, %s673_s12   ;;  %p979_p10 = scmp.ne.s32.totalorder %s972_s24, 0 }
  0x84   : > { %p980_p11 = scmp.ge.s32.totalorder %s693_s17, 2  ;;  %s328_s27 = scalar_lea.sflag [#allocation4], %s327_s28 }
  0x86   : > { %p482_p3 = pnand %p980_p11, %p979_p10 }
  0x88   : > { %668 = dma.done.wait (!%p482_p3), %s328_s27, 96  }
  0x89   : > { %670 = vsyncadd (!%p482_p3), %s328_s27, 4294967200  ;;  %s21_s17 = sadd.s32 1, %s693_s17   ;;  %s981_s12 = smov %s677_s13 }
  0x8a   : > { %p18_p7 = scmp.ge.s32.totalorder %s21_s17, 4   ;;  %s982_s13 = smov %s681_s14 }
  0x8b   : > { %s983_s14 = smov %s839_s26  ;;  %s984_s15 = smov %s689_s16 }
  0x8c   : > { %s985_s16 = smov %s987_s5  ;;  %20 = sbr.rel (!%p18_p7) target bundleno = 8 (0x8), region = 92 }
  0x93   :  { %333 = vsyncpa [#allocation3], 1 }
  0x94   :  { %335 = vsyncpa [#allocation3 + $0x1], 1 }
  0x95   :  { %336 = vsyncpa [#allocation4], 1 }
  0x96   :  { %338 = vsyncpa [#allocation4 + $0x1], 1 }
  0x97   :  { %339 = vsyncpa [#allocation5], 1 }
  0x98   :  { %341 = vsyncpa [#allocation5 + $0x1], 1 }
  0x99   :  { %342 = vsyncpa [#allocation6], 1 }
  0x9a   :  { %344 = vsyncpa [#allocation6 + $0x1], 1 }

</bundles_post_ra>
